<compile_context>
chip_gen: v6e
topology: v6e:2x2x1
jax: 0.10.0
libtpu: 0.0.40
codegen_flags: <defaults>
</compile_context>

<pallas_src>
import functools
import math

import jax
import jax.numpy as jnp
from jax.experimental import pallas as pl
from jax.experimental.pallas import tpu as pltpu


def _round_up(x, m):
    return (x + m - 1) // m * m


# ----------------------------------------------------------------------------
# Pallas kernels: fused (im2col-)matmul + folded-BN bias (+ residual) (+ relu)
# Grid = (M tiles ["parallel"], K tiles ["arbitrary", last]).
# ----------------------------------------------------------------------------
def _matmul_bn_kernel(a_ref, w_ref, bias_ref, o_ref, acc_ref, *, apply_relu):
    k = pl.program_id(1)

    @pl.when(k == 0)
    def _():
        acc_ref[...] = jnp.zeros_like(acc_ref)

    acc_ref[...] += jnp.dot(a_ref[...], w_ref[...],
                            preferred_element_type=jnp.float32)

    @pl.when(k == pl.num_programs(1) - 1)
    def _():
        out = acc_ref[...] + bias_ref[...]
        if apply_relu:
            out = jnp.maximum(out, 0.0)
        o_ref[...] = out.astype(o_ref.dtype)


def _matmul_bn_res_kernel(a_ref, w_ref, bias_ref, res_ref, o_ref, acc_ref,
                          *, apply_relu):
    k = pl.program_id(1)

    @pl.when(k == 0)
    def _():
        acc_ref[...] = jnp.zeros_like(acc_ref)

    acc_ref[...] += jnp.dot(a_ref[...], w_ref[...],
                            preferred_element_type=jnp.float32)

    @pl.when(k == pl.num_programs(1) - 1)
    def _():
        out = acc_ref[...] + bias_ref[...] + res_ref[...].astype(jnp.float32)
        if apply_relu:
            out = jnp.maximum(out, 0.0)
        o_ref[...] = out.astype(o_ref.dtype)


def fused_matmul_bn_act(a, w_scaled, bias, residual=None, apply_relu=False,
                        out_dtype=jnp.bfloat16):
    """a: (M, K) patches, w_scaled: (K, N) BN-scale-folded weights,
    bias: (N,) f32 folded-BN bias, residual: optional (M, N)."""
    M, K = a.shape
    Kw, N = w_scaled.shape
    assert Kw == K

    a = a.astype(jnp.bfloat16)
    w_scaled = w_scaled.astype(jnp.bfloat16)
    bias2 = bias.reshape(1, N).astype(jnp.float32)
    if residual is not None:
        residual = residual.astype(jnp.bfloat16)

    # --- K tiling: single step for modest K, 512-wide steps (zero-padded)
    #     when K = 9*Cin grows, so the resident (tk, N) weight block and the
    #     (tm, tk) A tile stay well inside v7x's 32 MiB scoped VMEM.
    if K > 1024:
        tk = 512
        K_pad = _round_up(K, tk)
    else:
        tk = K
        K_pad = K
    if K_pad != K:
        a = jnp.pad(a, ((0, 0), (0, K_pad - K)))
        w_scaled = jnp.pad(w_scaled, ((0, K_pad - K), (0, 0)))

    # --- M tiling: pad rows to a multiple of 128 so the grid is always
    #     pipelined / megacore-shardable; grow the tile (256/512) when the
    #     double-buffered footprint still fits a conservative VMEM budget
    #     (helps v5e/v6e HBM roofline; stays safe on v7x).
    out_bytes = jnp.dtype(out_dtype).itemsize
    res_bytes = 2 if residual is not None else 0
    M_pad = _round_up(M, 128)
    tm = 128
    for cand in (512, 256):
        if M_pad % cand != 0:
            continue
        footprint = (2 * (cand * tk * 2 + tk * N * 2
                          + cand * N * (out_bytes + res_bytes))
                     + cand * N * 4)
        if footprint <= 20 * 1024 * 1024:
            tm = cand
            break
    if M_pad != M:
        a = jnp.pad(a, ((0, M_pad - M), (0, 0)))
        if residual is not None:
            residual = jnp.pad(residual, ((0, M_pad - M), (0, 0)))

    grid = (M_pad // tm, K_pad // tk)

    cost = pl.CostEstimate(
        flops=2 * M_pad * K_pad * N,
        transcendentals=0,
        bytes_accessed=(M_pad * K_pad * 2 + K_pad * N * 2 + N * 4
                        + M_pad * N * (out_bytes + res_bytes)))

    common_in_specs = [
        pl.BlockSpec((tm, tk), lambda i, k: (i, k)),   # A patches
        pl.BlockSpec((tk, N), lambda i, k: (k, 0)),    # scaled weights
        pl.BlockSpec((1, N), lambda i, k: (0, 0)),     # folded-BN bias
    ]

    if residual is None:
        kernel = functools.partial(_matmul_bn_kernel, apply_relu=apply_relu)
        in_specs = common_in_specs
        args = (a, w_scaled, bias2)
    else:
        kernel = functools.partial(_matmul_bn_res_kernel, apply_relu=apply_relu)
        in_specs = common_in_specs + [
            pl.BlockSpec((tm, N), lambda i, k: (i, 0)),  # residual
        ]
        args = (a, w_scaled, bias2, residual)

    out = pl.pallas_call(
        kernel,
        out_shape=jax.ShapeDtypeStruct((M_pad, N), out_dtype),
        grid=grid,
        in_specs=in_specs,
        out_specs=pl.BlockSpec((tm, N), lambda i, k: (i, 0)),
        scratch_shapes=[pltpu.VMEM((tm, N), jnp.float32)],
        compiler_params=pltpu.CompilerParams(
            dimension_semantics=("parallel", "arbitrary")),
        cost_estimate=cost,
    )(*args)

    return out[:M] if M_pad != M else out


# ----------------------------------------------------------------------------
# Glue: im2col patch extraction (plain JAX slices, kept in bf16)
# ----------------------------------------------------------------------------
def im2col_3x3(x_nhwc, stride):
    N, H, W, C = x_nhwc.shape
    pad = 1
    xp = jnp.pad(x_nhwc, ((0, 0), (pad, pad), (pad, pad), (0, 0)))
    Ho = (H + 2 * pad - 3) // stride + 1
    Wo = (W + 2 * pad - 3) // stride + 1
    patches = []
    for dh in range(3):
        for dw in range(3):
            patches.append(
                xp[:, dh:dh + stride * Ho:stride, dw:dw + stride * Wo:stride, :])
    pat = jnp.stack(patches, axis=3)                  # (N, Ho, Wo, 9, C)
    return pat.reshape(N * Ho * Wo, 9 * C), (N, Ho, Wo)


def conv3x3_bn(x_nhwc, w_oihw, bn_scale, bn_bias, stride,
               residual=None, apply_relu=False):
    cout, cin, kh, kw = w_oihw.shape
    a, (N, Ho, Wo) = im2col_3x3(x_nhwc, stride)
    # (Cout, Cin, kh, kw) -> (kh, kw, Cin, Cout) -> (kh*kw*Cin, Cout)
    wmat = jnp.transpose(w_oihw, (2, 3, 1, 0)).reshape(kh * kw * cin, cout)
    wmat = wmat * bn_scale[None, :]                   # fold BN scale (eval)
    res_flat = None
    if residual is not None:
        res_flat = residual.reshape(N * Ho * Wo, cout)
    out = fused_matmul_bn_act(a, wmat, bn_bias,
                              residual=res_flat, apply_relu=apply_relu)
    return out.reshape(N, Ho, Wo, cout)


def conv1x1_bn(x_nhwc, w_oihw, bn_scale, bn_bias, stride):
    cout, cin = w_oihw.shape[0], w_oihw.shape[1]
    xs = x_nhwc[:, ::stride, ::stride, :]
    N, Ho, Wo, _ = xs.shape
    a = xs.reshape(N * Ho * Wo, cin)
    wmat = w_oihw.reshape(cout, cin).T * bn_scale[None, :]   # (Cin, Cout), scale folded
    out = fused_matmul_bn_act(a, wmat, bn_bias,
                              residual=None, apply_relu=False)
    return out.reshape(N, Ho, Wo, cout)


# ----------------------------------------------------------------------------
# BasicBlock (expansion = 1) and BlocksContainer
# ----------------------------------------------------------------------------
def _bn_identity(c, eps=1e-5):
    # gamma=1, beta=0, running_mean=0, running_var=1 (fresh BN, eval mode)
    scale = jnp.ones((c,), jnp.float32) / jnp.sqrt(1.0 + eps)
    bias = jnp.zeros((c,), jnp.float32)
    return scale, bias


def init_basic_block_params(key, in_c, out_c, stride):
    k1, k2, k3 = jax.random.split(key, 3)
    std1 = math.sqrt(2.0 / (9 * in_c))
    std2 = math.sqrt(2.0 / (9 * out_c))
    p = {
        "w1": jax.random.normal(k1, (out_c, in_c, 3, 3), jnp.float32) * std1,
        "bn1": _bn_identity(out_c),
        "w2": jax.random.normal(k2, (out_c, out_c, 3, 3), jnp.float32) * std2,
        "bn2": _bn_identity(out_c),
        "stride": stride,
        "has_shortcut": (stride != 1 or in_c != out_c),
    }
    if p["has_shortcut"]:
        p["ws"] = jax.random.normal(k3, (out_c, in_c, 1, 1), jnp.float32) * math.sqrt(2.0 / in_c)
        p["bns"] = _bn_identity(out_c)
    return p


def basic_block_forward(x_nhwc, p):
    stride = p["stride"]
    out = conv3x3_bn(x_nhwc, p["w1"], *p["bn1"], stride, apply_relu=True)
    if p["has_shortcut"]:
        shortcut = conv1x1_bn(x_nhwc, p["ws"], *p["bns"], stride)
    else:
        shortcut = x_nhwc
    # conv2 + bn2 + residual add + relu fused into one kernel call
    out = conv3x3_bn(out, p["w2"], *p["bn2"], 1,
                     residual=shortcut, apply_relu=True)
    return out


class BlocksContainer:
    """JAX/Pallas port of BlocksContainer (block = ResNet BasicBlock, expansion=1)."""

    def __init__(self, in_channels, out_channels, num_blocks, stride, key):
        strides = [stride] + [1] * (num_blocks - 1)
        # qz_loga: normal(...) twice then fill_(1)  ->  deterministically all ones
        self.qz_loga = jnp.ones((out_channels,), jnp.float32)
        self.fine_tune = False
        self.blocks = []
        c_in = in_channels
        for s in strides:
            key, sub = jax.random.split(key)
            self.blocks.append(init_basic_block_params(sub, c_in, out_channels, s))
            c_in = out_channels  # block.expansion == 1

    def __call__(self, x_nchw):
        # NCHW -> NHWC, activations carried in bf16 between layers
        x = jnp.transpose(x_nchw, (0, 2, 3, 1)).astype(jnp.bfloat16)
        for p in self.blocks:
            x = basic_block_forward(x, p)
        return jnp.transpose(x, (0, 3, 1, 2)).astype(jnp.float32)  # NHWC -> NCHW


# ----------------------------------------------------------------------------
if __name__ == "__main__":
    key = jax.random.PRNGKey(0)
    k_x, k_p = jax.random.split(key)

    # small shapes: batch=2, in_channels=4, spatial=16x16, out_channels=8,
    # num_blocks=2, stride=2
    x = jax.random.normal(k_x, (2, 4, 16, 16), jnp.float32)   # NCHW, like PyTorch

    container = BlocksContainer(in_channels=4, out_channels=8,
                                num_blocks=2, stride=2, key=k_p)

    y = container(x)
    y = jax.block_until_ready(y)
    assert y.shape == (2, 8, 8, 8), y.shape
    assert jnp.all(jnp.isfinite(y))
    print("KERNEL_OK")
</pallas_src>

<mosaic_0001>
module attributes {stable_mosaic.version = 11 : i64} {
  func.func @_matmul_bn_kernel(%arg0: i32, %arg1: i32, %arg2: memref<128x36xbf16, #tpu.memory_space<vmem>>, %arg3: memref<36x8xbf16, #tpu.memory_space<vmem>>, %arg4: memref<1x8xf32, #tpu.memory_space<vmem>>, %arg5: memref<128x8xbf16, #tpu.memory_space<vmem>>, %arg6: memref<128x8xf32, #tpu.memory_space<vmem>>) attributes {dimension_semantics = [#tpu.dimension_semantics<parallel>, #tpu.dimension_semantics<arbitrary>], iteration_bounds = array<i64: 1, 1>, scalar_prefetch = 0 : i64, scratch_operands = 1 : i64, tpu.core_type = #tpu.core_type<tc>, window_params = [{transform_indices = @transform_0, window_bounds = array<i64: 128, 36>}, {transform_indices = @transform_1, window_bounds = array<i64: 36, 8>}, {pipeline_mode = #tpu.pipeline_mode<synchronous>, transform_indices = @transform_2, window_bounds = array<i64: 1, 8>}, {transform_indices = @transform_3, window_bounds = array<i64: 128, 8>}]} {
    %c0_i32 = arith.constant 0 : i32
    %0 = arith.cmpi eq, %arg1, %c0_i32 : i32
    %1 = arith.extui %0 : i1 to i32
    %c0_i32_0 = arith.constant 0 : i32
    %2 = arith.cmpi ne, %1, %c0_i32_0 : i32
    scf.if %2 {
      %cst_10 = arith.constant 0.000000e+00 : f32
      %12 = vector.broadcast %cst_10 : f32 to vector<128x8xf32>
      %c0_11 = arith.constant 0 : index
      %c0_12 = arith.constant 0 : index
      %13 = vector.load %arg6[%c0_11, %c0_12] : memref<128x8xf32, #tpu.memory_space<vmem>>, vector<128x8xf32>
      tpu.vector_store %arg6[%c0_11, %c0_12], %12 {strides = array<i32>} : memref<128x8xf32, #tpu.memory_space<vmem>>, vector<128x8xf32>,
    } else {
    }
    %c0 = arith.constant 0 : index
    %c0_1 = arith.constant 0 : index
    %3 = vector.load %arg6[%c0, %c0_1] : memref<128x8xf32, #tpu.memory_space<vmem>>, vector<128x8xf32>
    %c0_2 = arith.constant 0 : index
    %c0_3 = arith.constant 0 : index
    %4 = vector.load %arg2[%c0_2, %c0_3] : memref<128x36xbf16, #tpu.memory_space<vmem>>, vector<128x36xbf16>
    %c0_4 = arith.constant 0 : index
    %c0_5 = arith.constant 0 : index
    %5 = vector.load %arg3[%c0_4, %c0_5] : memref<36x8xbf16, #tpu.memory_space<vmem>>, vector<36x8xbf16>
    %cst = arith.constant dense<0.000000e+00> : vector<128x8xf32>
    %6 = tpu.matmul %4, %5, %cst {dimension_numbers = #tpu.dot_dimension_numbers<[1], [0], [0], [1], [0, 0, 1, 1], [], []>} : vector<128x36xbf16>, vector<36x8xbf16>, vector<128x8xf32> -> vector<128x8xf32>
    %7 = arith.addf %3, %6 : vector<128x8xf32>
    %c0_6 = arith.constant 0 : index
    %c0_7 = arith.constant 0 : index
    %8 = vector.load %arg6[%c0_6, %c0_7] : memref<128x8xf32, #tpu.memory_space<vmem>>, vector<128x8xf32>
    tpu.vector_store %arg6[%c0_6, %c0_7], %7 {strides = array<i32>} : memref<128x8xf32, #tpu.memory_space<vmem>>, vector<128x8xf32>,
    %c0_i32_8 = arith.constant 0 : i32
    %9 = arith.cmpi eq, %arg1, %c0_i32_8 : i32
    %10 = arith.extui %9 : i1 to i32
    %c0_i32_9 = arith.constant 0 : i32
    %11 = arith.cmpi ne, %10, %c0_i32_9 : i32
    scf.if %11 {
      %c0_10 = arith.constant 0 : index
      %c0_11 = arith.constant 0 : index
      %12 = vector.load %arg6[%c0_10, %c0_11] : memref<128x8xf32, #tpu.memory_space<vmem>>, vector<128x8xf32>
      %c0_12 = arith.constant 0 : index
      %c0_13 = arith.constant 0 : index
      %13 = vector.load %arg4[%c0_12, %c0_13] : memref<1x8xf32, #tpu.memory_space<vmem>>, vector<1x8xf32>
      %14 = vector.broadcast %13 : vector<1x8xf32> to vector<128x8xf32>
      %15 = arith.addf %12, %14 : vector<128x8xf32>
      %cst_14 = arith.constant 0.000000e+00 : f32
      %16 = vector.broadcast %cst_14 : f32 to vector<128x8xf32>
      %17 = arith.maximumf %15, %16 : vector<128x8xf32>
      %18 = arith.truncf %17 : vector<128x8xf32> to vector<128x8xbf16>
      %c0_15 = arith.constant 0 : index
      %c0_16 = arith.constant 0 : index
      %19 = vector.load %arg5[%c0_15, %c0_16] : memref<128x8xbf16, #tpu.memory_space<vmem>>, vector<128x8xbf16>
      tpu.vector_store %arg5[%c0_15, %c0_16], %18 {strides = array<i32>} : memref<128x8xbf16, #tpu.memory_space<vmem>>, vector<128x8xbf16>,
    } else {
    }
    return
  }
  func.func @transform_0(%arg0: i32, %arg1: i32) -> (i32, i32) {
    %c0_i32 = arith.constant 0 : i32
    return %arg0, %arg1 : i32, i32
  }
  func.func @transform_1(%arg0: i32, %arg1: i32) -> (i32, i32) {
    %c0_i32 = arith.constant 0 : i32
    %c0_i32_0 = arith.constant 0 : i32
    return %arg1, %c0_i32 : i32, i32
  }
  func.func @transform_2(%arg0: i32, %arg1: i32) -> (i32, i32) {
    %c0_i32 = arith.constant 0 : i32
    %c0_i32_0 = arith.constant 0 : i32
    %c0_i32_1 = arith.constant 0 : i32
    return %c0_i32, %c0_i32_0 : i32, i32
  }
  func.func @transform_3(%arg0: i32, %arg1: i32) -> (i32, i32) {
    %c0_i32 = arith.constant 0 : i32
    %c0_i32_0 = arith.constant 0 : i32
    return %arg0, %c0_i32 : i32, i32
  }
}

</mosaic_0001>

<bundles_post_ra>
// kernel: tpu_custom_call.1
= control target key start
LH: loop header
LB: loop body
LE: loop exit
PB: predicated region body
PF: predicated region fallthrough
CT: control target
= control target key end

     0   :  { %vm153_vm0 = vcmask 1041408   ;;  %vm128_vm1 = vcmask 293888   ;;  %vm19_vm2 = vcmask 64512   ;;  %v535_v2 = vmov 0.0   ;;  %s717_s1 = inlined_call_operand.vmem [shape: bf16[36,8], index: 1, kind: input, shape index: {}]   ;;  %s718_s0 = inlined_call_operand.vmem [shape: bf16[128,36], index: 0, kind: input, shape index: {}]   ;;  %s719_s2 = inlined_call_operand.vmem [shape: f32[1,8], index: 2, kind: input, shape index: {}]   ;;  %s720_s3 = inlined_call_operand.vmem [shape: bf16[128,8], index: 3, kind: output, shape index: {}]  }
   0x1   :  { %v524_v0 = vld [vmem:[%s717_s1 + $0x10] ss:$0 sps:$4 sm:$0x33]   ;;  %v525_v1 = vld [vmem:[%s717_s1 + $0x8] sm:$0xff]   ;;  %22 = vst.msk [vmem:[#allocation2 + $0x10] sm:$0xff] %vm19_vm2, %v535_v2  ;;  %20 = vst.msk [vmem:[#allocation2] sm:$0xff] %vm19_vm2, %v535_v2 }
   0x2   :  { %21 = vst.msk [vmem:[#allocation2 + $0x8] sm:$0xff] %vm19_vm2, %v535_v2  ;;  %23 = vst.msk [vmem:[#allocation2 + $0x18] sm:$0xff] %vm19_vm2, %v535_v2  ;;  %521 = vmatprep.subr.msk.bf16.mxu0 %vm153_vm0, %v524_v0  ;;  %522 = vmatprep.subr.msk.bf16.mxu1 %vm153_vm0, %v524_v0  ;;  %v155_v3 = vsel %vm153_vm0, %v524_v0, 0  ;;  %v526_v4 = vld [vmem:[%s717_s1] sm:$0xff]   ;;  %v529_v7 = vld [vmem:[%s718_s0 + $0x8] sm:$0xff]   ;;  %vm409_vm3 = vcmask 60416  }
   0x3   :  { %24 = vst.msk [vmem:[#allocation2 + $0x20] sm:$0xff] %vm19_vm2, %v535_v2  ;;  %25 = vst.msk [vmem:[#allocation2 + $0x28] sm:$0xff] %vm19_vm2, %v535_v2  ;;  %494 = vmatpush3.bf16.msra.mxu0 %v155_v3  ;;  %518 = vmatpush3.bf16.msra.mxu1 %v155_v3  ;;  %v527_v5 = vld [vmem:[%s718_s0] sm:$0xff]   ;;  %v530_v8 = vld [vmem:[%s718_s0 + $0x28] sm:$0xff]  }
   0x4   :  { %26 = vst.msk [vmem:[#allocation2 + $0x30] sm:$0xff] %vm19_vm2, %v535_v2  ;;  %27 = vst.msk [vmem:[#allocation2 + $0x38] sm:$0xff] %vm19_vm2, %v535_v2  ;;  %495 = vmatprep.subr.bf16.mxu0 %v525_v1  ;;  %516 = vmatprep.subr.bf16.mxu1 %v525_v1  ;;  %v528_v6 = vld [vmem:[%s718_s0 + $0x20] sm:$0xff]   ;;  %v531_v9 = vld [vmem:[%s718_s0 + $0x10] sm:$0xff]  }
   0x5   :  { %28 = vst.msk [vmem:[#allocation2 + $0x40] sm:$0xff] %vm19_vm2, %v535_v2  ;;  %29 = vst.msk [vmem:[#allocation2 + $0x48] sm:$0xff] %vm19_vm2, %v535_v2  ;;  %499 = vmatprep.mubr.msk.bf16.mxu0 %vm128_vm1, %v527_v5  ;;  %507 = vmatprep.mubr.msk.bf16.mxu1 %vm128_vm1, %v528_v6  ;;  %v532_v10 = vld [vmem:[%s718_s0 + $0x30] sm:$0xff]   ;;  %v533_v11 = vld [vmem:[%s718_s0 + $0x18] sm:$0xff]  }
   0x6   :  { %30 = vst.msk [vmem:[#allocation2 + $0x50] sm:$0xff] %vm19_vm2, %v535_v2  ;;  %31 = vst.msk [vmem:[#allocation2 + $0x58] sm:$0xff] %vm19_vm2, %v535_v2  ;;  %v534_v12 = vld [vmem:[%s718_s0 + $0x38] sm:$0xff]   ;;  %v625_v39 = vld [vmem:[%s719_s2] ss:$0 sm:$0xff] }
   0x7   :  { %32 = vst.msk [vmem:[#allocation2 + $0x60] sm:$0xff] %vm19_vm2, %v535_v2  ;;  %33 = vst.msk [vmem:[#allocation2 + $0x68] sm:$0xff] %vm19_vm2, %v535_v2  ;;  %496 = vmatpush3.bf16.msra.mxu0 %v525_v1  ;;  %519 = vmatpush3.bf16.msra.mxu1 %v525_v1 }
   0x8   :  { %34 = vst.msk [vmem:[#allocation2 + $0x70] sm:$0xff] %vm19_vm2, %v535_v2  ;;  %35 = vst.msk [vmem:[#allocation2 + $0x78] sm:$0xff] %vm19_vm2, %v535_v2  ;;  %497 = vmatprep.subr.bf16.mxu0 %v526_v4  ;;  %517 = vmatprep.subr.bf16.mxu1 %v526_v4  ;;  %v38_v13 = vld [vmem:[#allocation2 + $0x10] sm:$0xff]  ;;  %v36_v17 = vld [vmem:[#allocation2] sm:$0xff] }
   0x9   :  { %v39_v23 = vld [vmem:[#allocation2 + $0x18] sm:$0xff]  ;;  %v37_v29 = vld [vmem:[#allocation2 + $0x8] sm:$0xff] }
   0xa   :  { %v40_v42 = vld [vmem:[#allocation2 + $0x20] sm:$0xff]  ;;  %v41_v0 = vld [vmem:[#allocation2 + $0x28] sm:$0xff] }
   0xb   :  { %498 = vmatpush3.bf16.msra.mxu0 %v526_v4  ;;  %520 = vmatpush3.bf16.msra.mxu1 %v526_v4  ;;  %v42_v35 = vld [vmem:[#allocation2 + $0x30] sm:$0xff]  ;;  %v43_v54 = vld [vmem:[#allocation2 + $0x38] sm:$0xff] }
   0xc   :  { %v44_v18 = vld [vmem:[#allocation2 + $0x40] sm:$0xff]  ;;  %v45_v30 = vld [vmem:[#allocation2 + $0x48] sm:$0xff] }
   0xd   :  { %v46_v14 = vld [vmem:[#allocation2 + $0x50] sm:$0xff]  ;;  %v47_v24 = vld [vmem:[#allocation2 + $0x58] sm:$0xff] }
   0xe   :  { %500 = vmatmul.mubr.msk.bf16.vlgmr.msra.gmra.mxu0 %vm128_vm1, %v529_v7  ;;  %508 = vmatmul.mubr.msk.bf16.vlgmr.msra.gmra.mxu1 %vm128_vm1, %v530_v8  ;;  %v48_v43 = vld [vmem:[#allocation2 + $0x60] sm:$0xff]  ;;  %v49_v1 = vld [vmem:[#allocation2 + $0x68] sm:$0xff] }
   0xf   :  { %503 = vmatprep.mubr.msk.bf16.mxu0 %vm128_vm1, %v531_v9  ;;  %511 = vmatprep.mubr.msk.bf16.mxu1 %vm128_vm1, %v532_v10  ;;  %v50_v36 = vld [vmem:[#allocation2 + $0x70] sm:$0xff]  ;;  %v51_v55 = vld [vmem:[#allocation2 + $0x78] sm:$0xff] }
  0x16   :  { %504 = vmatmul.mubr.msk.bf16.gmra.mxu0 %vm128_vm1, %v533_v11  ;;  %512 = vmatmul.mubr.msk.bf16.gmra.mxu1 %vm128_vm1, %v534_v12 }
  0xce   :  { %v501_v15 = vpop.f32.mrf.mxu0  ;;  %v509_v16 = vpop.f32.mrf.mxu1 }
  0xcf   :  { %v256_v19 = vadd.f32 %v501_v15, %v38_v13  ;;  %v264_v20 = vadd.f32 %v509_v16, %v46_v14 }
  0xd0   :  { %v191_v21 = vpop.f32.mrf.mxu0  ;;  %v223_v22 = vpop.f32.mrf.mxu1 }
  0xd1   :  { %273 = vst.msk [vmem:[#allocation2 + $0x10] sm:$0xff] %vm19_vm2, %v256_v19  ;;  %281 = vst.msk [vmem:[#allocation2 + $0x50] sm:$0xff] %vm19_vm2, %v264_v20  ;;  %v254_v25 = vadd.f32 %v191_v21, %v36_v17  ;;  %v262_v26 = vadd.f32 %v223_v22, %v44_v18 }
  0xd2   :  { %v502_v27 = vpop.f32.mrf.mxu0  ;;  %v510_v28 = vpop.f32.mrf.mxu1 }
  0xd3   :  { %271 = vst.msk [vmem:[#allocation2] sm:$0xff] %vm19_vm2, %v254_v25  ;;  %279 = vst.msk [vmem:[#allocation2 + $0x40] sm:$0xff] %vm19_vm2, %v262_v26  ;;  %v257_v31 = vadd.f32 %v502_v27, %v39_v23  ;;  %v265_v32 = vadd.f32 %v510_v28, %v47_v24 }
  0xd4   :  { %v194_v33 = vpop.f32.mrf.mxu0  ;;  %v226_v34 = vpop.f32.mrf.mxu1 }
  0xd5   :  { %274 = vst.msk [vmem:[#allocation2 + $0x18] sm:$0xff] %vm19_vm2, %v257_v31  ;;  %282 = vst.msk [vmem:[#allocation2 + $0x58] sm:$0xff] %vm19_vm2, %v265_v32  ;;  %v255_v37 = vadd.f32 %v194_v33, %v37_v29  ;;  %v263_v38 = vadd.f32 %v226_v34, %v45_v30 }
  0xd6   :  { %v505_v40 = vpop.f32.mrf.mxu0  ;;  %v513_v41 = vpop.f32.mrf.mxu1 }
  0xd7   :  { %272 = vst.msk [vmem:[#allocation2 + $0x8] sm:$0xff] %vm19_vm2, %v255_v37  ;;  %280 = vst.msk [vmem:[#allocation2 + $0x48] sm:$0xff] %vm19_vm2, %v263_v38  ;;  %v260_v44 = vadd.f32 %v505_v40, %v42_v35  ;;  %v268_v45 = vadd.f32 %v513_v41, %v50_v36 }
  0xd8   :  { %v292_v46 = vld [vmem:[#allocation2 + $0x10] sm:$0xff]  ;;  %v207_v48 = vpop.f32.mrf.mxu0  ;;  %v239_v49 = vpop.f32.mrf.mxu1 }
  0xd9   :  { %v300_v47 = vld [vmem:[#allocation2 + $0x50] sm:$0xff]  ;;  %v315_v50 = vadd.f32 %v625_v39, %v292_v46  ;;  %277 = vst.msk [vmem:[#allocation2 + $0x30] sm:$0xff] %vm19_vm2, %v260_v44  ;;  %285 = vst.msk [vmem:[#allocation2 + $0x70] sm:$0xff] %vm19_vm2, %v268_v45  ;;  %v258_v52 = vadd.f32 %v207_v48, %v40_v42  ;;  %v266_v53 = vadd.f32 %v239_v49, %v48_v43 }
  0xda   :  { %v323_v51 = vadd.f32 %v625_v39, %v300_v47  ;;  %v290_v56 = vld [vmem:[#allocation2] sm:$0xff]  ;;  %v506_v58 = vpop.f32.mrf.mxu0  ;;  %v514_v59 = vpop.f32.mrf.mxu1 }
  0xdb   :  { %v298_v57 = vld [vmem:[#allocation2 + $0x40] sm:$0xff]  ;;  %v331_v60 = vmax.f32 %v315_v50, 0.0  ;;  %v313_v62 = vadd.f32 %v625_v39, %v290_v56  ;;  %275 = vst.msk [vmem:[#allocation2 + $0x20] sm:$0xff] %vm19_vm2, %v258_v52  ;;  %283 = vst.msk [vmem:[#allocation2 + $0x60] sm:$0xff] %vm19_vm2, %v266_v53  ;;  %v261_v4 = vadd.f32 %v506_v58, %v43_v54  ;;  %v269_v5 = vadd.f32 %v514_v59, %v51_v55 }
  0xdc   :  { %v339_v61 = vmax.f32 %v323_v51, 0.0  ;;  %v321_v63 = vadd.f32 %v625_v39, %v298_v57  ;;  %v293_v2 = vld [vmem:[#allocation2 + $0x18] sm:$0xff]  ;;  %v210_v6 = vpop.f32.mrf.mxu0  ;;  %v242_v7 = vpop.f32.mrf.mxu1 }
  0xdd   :  { %v301_v3 = vld [vmem:[#allocation2 + $0x58] sm:$0xff]  ;;  %v468_v8 = vpack.c.bf16 %v331_v60, %v331_v60  ;;  %v329_v10 = vmax.f32 %v313_v62, 0.0  ;;  %v316_v12 = vadd.f32 %v625_v39, %v293_v2  ;;  %278 = vst.msk [vmem:[#allocation2 + $0x38] sm:$0xff] %vm19_vm2, %v261_v4  ;;  %286 = vst.msk [vmem:[#allocation2 + $0x78] sm:$0xff] %vm19_vm2, %v269_v5  ;;  %v259_v16 = vadd.f32 %v210_v6, %v41_v0 }
  0xde   :  { %v476_v9 = vpack.c.bf16 %v339_v61, %v339_v61  ;;  %v337_v11 = vmax.f32 %v321_v63, 0.0  ;;  %v324_v13 = vadd.f32 %v625_v39, %v301_v3  ;;  %v291_v14 = vld [vmem:[#allocation2 + $0x8] sm:$0xff]  ;;  %v267_v17 = vadd.f32 %v242_v7, %v49_v1 }
  0xdf   :  { %v299_v15 = vld [vmem:[#allocation2 + $0x48] sm:$0xff]  ;;  %412 = vst.msk [vmem:[%s720_s3 + $0x8] sm:$0xf] %vm409_vm3, %v468_v8  ;;  %v466_v18 = vpack.c.bf16 %v329_v10, %v329_v10  ;;  %v314_v20 = vadd.f32 %v625_v39, %v291_v14  ;;  %v332_v22 = vmax.f32 %v316_v12, 0.0 }
  0xe0   :  { %420 = vst.msk [vmem:[%s720_s3 + $0x28] sm:$0xf] %vm409_vm3, %v476_v9  ;;  %v474_v19 = vpack.c.bf16 %v337_v11, %v337_v11  ;;  %v322_v21 = vadd.f32 %v625_v39, %v299_v15  ;;  %v340_v23 = vmax.f32 %v324_v13, 0.0  ;;  %v296_v24 = vld [vmem:[#allocation2 + $0x30] sm:$0xff] }
  0xe1   :  { %v304_v25 = vld [vmem:[#allocation2 + $0x70] sm:$0xff]  ;;  %276 = vst.msk [vmem:[#allocation2 + $0x28] sm:$0xff] %vm19_vm2, %v259_v16  ;;  %284 = vst.msk [vmem:[#allocation2 + $0x68] sm:$0xff] %vm19_vm2, %v267_v17  ;;  %v330_v26 = vmax.f32 %v314_v20, 0.0  ;;  %v319_v28 = vadd.f32 %v625_v39, %v296_v24  ;;  %v469_v30 = vpack.c.bf16 %v332_v22, %v332_v22 }
  0xe2   :  { %410 = vst.msk [vmem:[%s720_s3] sm:$0xf] %vm409_vm3, %v466_v18  ;;  %418 = vst.msk [vmem:[%s720_s3 + $0x20] sm:$0xf] %vm409_vm3, %v474_v19  ;;  %v338_v27 = vmax.f32 %v322_v21, 0.0  ;;  %v327_v29 = vadd.f32 %v625_v39, %v304_v25  ;;  %v477_v31 = vpack.c.bf16 %v340_v23, %v340_v23  ;;  %v294_v32 = vld [vmem:[#allocation2 + $0x20] sm:$0xff] }
  0xe3   :  { %v302_v33 = vld [vmem:[#allocation2 + $0x60] sm:$0xff]  ;;  %v467_v34 = vpack.c.bf16 %v330_v26, %v330_v26  ;;  %v335_v36 = vmax.f32 %v319_v28, 0.0  ;;  %413 = vst.msk [vmem:[%s720_s3 + $0xc] sm:$0xf] %vm409_vm3, %v469_v30  ;;  %v317_v38 = vadd.f32 %v625_v39, %v294_v32 }
  0xe4   :  { %v475_v35 = vpack.c.bf16 %v338_v27, %v338_v27  ;;  %v343_v37 = vmax.f32 %v327_v29, 0.0  ;;  %421 = vst.msk [vmem:[%s720_s3 + $0x2c] sm:$0xf] %vm409_vm3, %v477_v31  ;;  %v325_v40 = vadd.f32 %v625_v39, %v302_v33  ;;  %v297_v43 = vld [vmem:[#allocation2 + $0x38] sm:$0xff] }
  0xe5   :  { %411 = vst.msk [vmem:[%s720_s3 + $0x4] sm:$0xf] %vm409_vm3, %v467_v34  ;;  %v472_v41 = vpack.c.bf16 %v335_v36, %v335_v36  ;;  %v305_v44 = vld [vmem:[#allocation2 + $0x78] sm:$0xff]  ;;  %v333_v45 = vmax.f32 %v317_v38, 0.0  ;;  %v320_v47 = vadd.f32 %v625_v39, %v297_v43 }
  0xe6   :  { %419 = vst.msk [vmem:[%s720_s3 + $0x24] sm:$0xf] %vm409_vm3, %v475_v35  ;;  %v480_v42 = vpack.c.bf16 %v343_v37, %v343_v37  ;;  %v341_v46 = vmax.f32 %v325_v40, 0.0  ;;  %v328_v48 = vadd.f32 %v625_v39, %v305_v44 }
  0xe7   :  { %416 = vst.msk [vmem:[%s720_s3 + $0x18] sm:$0xf] %vm409_vm3, %v472_v41  ;;  %v470_v51 = vpack.c.bf16 %v333_v45, %v333_v45  ;;  %v336_v53 = vmax.f32 %v320_v47, 0.0 }
  0xe8   :  { %424 = vst.msk [vmem:[%s720_s3 + $0x38] sm:$0xf] %vm409_vm3, %v480_v42  ;;  %v295_v49 = vld [vmem:[#allocation2 + $0x28] sm:$0xff]  ;;  %v478_v52 = vpack.c.bf16 %v341_v46, %v341_v46  ;;  %v344_v54 = vmax.f32 %v328_v48, 0.0 }
  0xe9   :  { %v303_v50 = vld [vmem:[#allocation2 + $0x68] sm:$0xff]  ;;  %v318_v55 = vadd.f32 %v625_v39, %v295_v49  ;;  %414 = vst.msk [vmem:[%s720_s3 + $0x10] sm:$0xf] %vm409_vm3, %v470_v51  ;;  %v473_v57 = vpack.c.bf16 %v336_v53, %v336_v53 }
  0xea   :  { %v326_v56 = vadd.f32 %v625_v39, %v303_v50  ;;  %422 = vst.msk [vmem:[%s720_s3 + $0x30] sm:$0xf] %vm409_vm3, %v478_v52  ;;  %v481_v58 = vpack.c.bf16 %v344_v54, %v344_v54 }
  0xeb   :  { %v334_v59 = vmax.f32 %v318_v55, 0.0  ;;  %417 = vst.msk [vmem:[%s720_s3 + $0x1c] sm:$0xf] %vm409_vm3, %v473_v57 }
  0xec   :  { %v342_v60 = vmax.f32 %v326_v56, 0.0  ;;  %425 = vst.msk [vmem:[%s720_s3 + $0x3c] sm:$0xf] %vm409_vm3, %v481_v58 }
  0xed   :  { %v471_v39 = vpack.c.bf16 %v334_v59, %v334_v59 }
  0xee   :  { %v479_v61 = vpack.c.bf16 %v342_v60, %v342_v60 }
  0xef   :  { %415 = vst.msk [vmem:[%s720_s3 + $0x14] sm:$0xf] %vm409_vm3, %v471_v39 }
  0xf0   :  { %423 = vst.msk [vmem:[%s720_s3 + $0x34] sm:$0xf] %vm409_vm3, %v479_v61 }

</bundles_post_ra>
